<compile_context>
chip_gen: v6e
topology: v6e:2x2x1
jax: 0.10.0
libtpu: 0.0.40
codegen_flags: <defaults>
</compile_context>

<pallas_src>
import jax
import jax.numpy as jnp
import numpy as np
from jax.experimental import pallas as pl
from jax.experimental.pallas import tpu as pltpu

L = 11            # sequence length implied by fc1 = Linear(32 * 11, 64)
LP = 16           # time/K axis padded to the bf16 sublane tile (row L = bias carrier)
C1, C2, H = 16, 32, 64


def _cnn_kernel(x_ref, w1_ref, w2_ref, b2_ref,
                wf1_ref, bf1_ref, wf2_ref, bf2_ref, o_ref):
    # x block: (LP, TB) bf16, time on sublanes, batch on lanes (lane-dense DMA).
    # Row L is the constant 1.0 that carries conv1's bias through w1.
    x = x_ref[...]

    # conv1 (1->16, k=3, pad=1) + bias as one matmul against the banded (176, LP) weight.
    h = jnp.dot(w1_ref[...], x, preferred_element_type=jnp.float32)       # (C1*L, TB)
    h = jnp.maximum(h, 0.0)

    # conv2 (16->32, k=3, pad=1) as one K=176 matmul against the banded weight.
    h2 = jnp.dot(w2_ref[...], h.astype(jnp.bfloat16),
                 preferred_element_type=jnp.float32)                      # (C2*L, TB)
    h2 = jnp.maximum(h2 + b2_ref[...], 0.0)

    # fc1 over the flattened (c*L + t) features: one K=352 matmul.
    z1 = jnp.dot(wf1_ref[...], h2.astype(jnp.bfloat16),
                 preferred_element_type=jnp.float32)                      # (H, TB)
    z1 = jnp.maximum(z1 + bf1_ref[...], 0.0)

    # fc2 (64 -> 1) on the VPU/XLU: broadcast-multiply + sublane reduce.
    logits = jnp.sum(z1 * wf2_ref[...], axis=0, keepdims=True) + bf2_ref[...]  # (1, TB)

    # Exact sigmoid (exp on the EUP); lane-dense (1, TB) store.
    o_ref[...] = 1.0 / (1.0 + jnp.exp(-logits))


def cnn_forward(x, kernel_params, *, tb=None):
    B = x.shape[0]
    assert x.shape == (B, L)
    if tb is None:
        # >= 2 grid steps whenever possible (v7x megacore + DMA/compute overlap),
        # large tiles to amortize per-step overhead; per-step VMEM ~3.5 KB/column
        # so tb<=4096 fits the 32 MiB scoped budget (and v7x's 64 MiB physical).
        tb = min(4096, max(128, 128 * pl.cdiv(pl.cdiv(B, 2), 128)))
    assert tb % 128 == 0
    nb = pl.cdiv(B, tb)
    b_pad = nb * tb
    w1t, w2t, b2c, wf1, bf1c, wf2c, bf2 = kernel_params

    # bf16 lane-dense input slab: (LP, b_pad), time on sublanes, batch on lanes.
    # Row L is set to 1.0 so w1t's column L injects conv1's bias for free.
    x_t = jnp.zeros((LP, b_pad), jnp.bfloat16)
    x_t = x_t.at[L, :].set(1.0)
    x_t = x_t.at[:L, :B].set(jnp.transpose(x).astype(jnp.bfloat16))

    flops = 2 * b_pad * (C1 * L * LP + C2 * L * C1 * L + H * C2 * L + H)
    bytes_accessed = (2 * LP * b_pad + 4 * b_pad
                      + 2 * (C1 * L * LP + C2 * L * C1 * L + H * C2 * L)
                      + 4 * (C2 * L + 2 * H + 1))

    out = pl.pallas_call(
        _cnn_kernel,
        out_shape=jax.ShapeDtypeStruct((1, b_pad), jnp.float32),
        grid=(nb,),
        in_specs=[
            pl.BlockSpec((LP, tb), lambda i: (0, i)),          # x slab (lane-dense, bf16)
            pl.BlockSpec((C1 * L, LP), lambda i: (0, 0)),      # conv1 banded weight + bias col
            pl.BlockSpec((C2 * L, C1 * L), lambda i: (0, 0)),  # conv2 banded weight (bf16)
            pl.BlockSpec((C2 * L, 1), lambda i: (0, 0)),       # conv2 bias column (fp32)
            pl.BlockSpec((H, C2 * L), lambda i: (0, 0)),       # fc1 weight (torch layout, bf16)
            pl.BlockSpec((H, 1), lambda i: (0, 0)),            # fc1 bias column (fp32)
            pl.BlockSpec((H, 1), lambda i: (0, 0)),            # fc2 weight column (fp32)
            pl.BlockSpec((1, 1), lambda i: (0, 0)),            # fc2 bias
        ],
        out_specs=pl.BlockSpec((1, tb), lambda i: (0, i)),
        compiler_params=pltpu.CompilerParams(
            dimension_semantics=("parallel",),
            # Let XLA fuse the pad/transpose/cast producer of the x slab into
            # the pallas_call operand (avoids an extra HBM round trip).
            allow_input_fusion=[True, False, False, False, False, False, False, False],
            vmem_limit_bytes=32 * 1024 * 1024),
        cost_estimate=pl.CostEstimate(
            flops=int(flops),
            transcendentals=int(b_pad),
            bytes_accessed=int(bytes_accessed)),
    )(x_t, w1t, w2t, b2c, wf1, bf1c, wf2c, bf2)

    return jnp.transpose(out[:, :B])                           # (B, 1)


def _build_banded_conv_weights(conv1_w, conv1_b, conv2_w):
    """Fold the 3-tap zero-padded convs into banded matmul weights (fp32 numpy)."""
    c1w = np.asarray(conv1_w)
    c1b = np.asarray(conv1_b)
    c2w = np.asarray(conv2_w)
    # band_k[t, t'] = 1  iff  t' == t + k - 1   (zero padding at the sequence ends)
    bands = [np.eye(L, k=k - 1, dtype=np.float32) for k in range(3)]

    # conv1: W1T[c*L + t, t'] = conv1_w[c, 0, k] where t' = t + k - 1; K padded to LP.
    # Column L carries conv1_b (paired with the constant-1.0 row of the x slab).
    w1t = np.zeros((C1, L, LP), np.float32)
    for k in range(3):
        w1t[:, :, :L] += c1w[:, 0, k][:, None, None] * bands[k][None]
    w1t[:, :, L] = c1b[:, None]
    w1t = w1t.reshape(C1 * L, LP)

    # conv2: W2T[o*L + t, i*L + t'] = conv2_w[o, i, k] where t' = t + k - 1.
    w2t = np.zeros((C2, L, C1, L), np.float32)
    for k in range(3):
        w2t += c2w[:, :, k][:, None, :, None] * bands[k][None, :, None, :]
    w2t = w2t.reshape(C2 * L, C1 * L)
    return w1t, w2t


def init_params(key):
    """Deterministic synthetic parameters with the same shapes as the PyTorch module."""
    ks = jax.random.split(key, 8)
    conv1_w = jax.random.normal(ks[0], (C1, 1, 3), jnp.float32) * 0.3   # (out, in, k)
    conv1_b = jax.random.normal(ks[1], (C1,), jnp.float32) * 0.1
    conv2_w = jax.random.normal(ks[2], (C2, C1, 3), jnp.float32) * 0.1
    conv2_b = jax.random.normal(ks[3], (C2,), jnp.float32) * 0.1
    fc1_w = jax.random.normal(ks[4], (H, C2 * L), jnp.float32) * 0.05   # torch Linear layout
    fc1_b = jax.random.normal(ks[5], (H,), jnp.float32) * 0.1
    fc2_w = jax.random.normal(ks[6], (1, H), jnp.float32) * 0.1
    fc2_b = jax.random.normal(ks[7], (1,), jnp.float32) * 0.1
    torch_params = (conv1_w, conv1_b, conv2_w, conv2_b, fc1_w, fc1_b, fc2_w, fc2_b)

    w1t, w2t = _build_banded_conv_weights(conv1_w, conv1_b, conv2_w)
    kernel_params = (
        jnp.asarray(w1t, jnp.bfloat16),                 # (C1*L, LP)  conv1 weight+bias band
        jnp.asarray(w2t, jnp.bfloat16),                 # (C2*L, C1*L)
        jnp.repeat(conv2_b, L).reshape(C2 * L, 1),      # (C2*L, 1)  fp32
        fc1_w.astype(jnp.bfloat16),                     # (H, C2*L) — torch flatten order matches
        fc1_b.reshape(H, 1),                            # (H, 1)     fp32
        jnp.transpose(fc2_w),                           # (H, 1)     fp32 (VPU fc2)
        fc2_b.reshape(1, 1),                            # (1, 1)     fp32
    )
    return torch_params, kernel_params


def reference_forward(x, torch_params):
    """Pure-JAX fp32 replica of the PyTorch forward (NCL convs, row-major flatten)."""
    conv1_w, conv1_b, conv2_w, conv2_b, fc1_w, fc1_b, fc2_w, fc2_b = torch_params
    B = x.shape[0]
    h = x[:, None, :]                                            # (B, 1, L)
    hp = jnp.pad(h, ((0, 0), (0, 0), (1, 1)))
    h = conv1_b[None, :, None] + sum(
        jnp.einsum('oi,bit->bot', conv1_w[:, :, k], hp[:, :, k:k + L]) for k in range(3))
    h = jnp.maximum(h, 0.0)
    hp = jnp.pad(h, ((0, 0), (0, 0), (1, 1)))
    h = conv2_b[None, :, None] + sum(
        jnp.einsum('oi,bit->bot', conv2_w[:, :, k], hp[:, :, k:k + L]) for k in range(3))
    h = jnp.maximum(h, 0.0)                                      # (B, C2, L)
    flat = h.reshape(B, -1)                                      # (B, C2*L), index = c*L + t
    z1 = jnp.maximum(flat @ fc1_w.T + fc1_b, 0.0)
    z2 = z1 @ fc2_w.T + fc2_b
    return jax.nn.sigmoid(z2)


def _check_banded_construction(torch_params):
    """Per-layer fp32 unit check of the banded-weight construction (host side)."""
    conv1_w, conv1_b, conv2_w, conv2_b = (np.asarray(p) for p in torch_params[:4])
    w1t, w2t = _build_banded_conv_weights(conv1_w, conv1_b, conv2_w)
    rng = np.random.default_rng(0)
    nb = 5
    xb = rng.standard_normal((nb, L)).astype(np.float32)
    # reference conv1
    xp = np.pad(xb[:, None, :], ((0, 0), (0, 0), (1, 1)))
    ref1 = conv1_b[None, :, None] + sum(
        np.einsum('oi,bit->bot', conv1_w[:, :, k], xp[:, :, k:k + L]) for k in range(3))
    # banded conv1 (bias via the constant-1.0 row)
    xt = np.zeros((LP, nb), np.float32)
    xt[:L] = xb.T
    xt[L] = 1.0
    got1 = (w1t @ xt).reshape(C1, L, nb).transpose(2, 0, 1)
    np.testing.assert_allclose(got1, ref1, atol=1e-5)
    # reference conv2 on relu(conv1)
    h = np.maximum(ref1, 0.0)
    hp = np.pad(h, ((0, 0), (0, 0), (1, 1)))
    ref2 = conv2_b[None, :, None] + sum(
        np.einsum('oi,bit->bot', conv2_w[:, :, k], hp[:, :, k:k + L]) for k in range(3))
    got2 = (w2t @ h.reshape(nb, C1 * L).T).reshape(C2, L, nb).transpose(2, 0, 1) \
        + conv2_b[None, :, None]
    np.testing.assert_allclose(got2, ref2, atol=1e-5)


if __name__ == "__main__":
    key = jax.random.PRNGKey(0)
    kx, kp = jax.random.split(key)
    torch_params, kernel_params = init_params(kp)

    # Dedicated per-layer check of the banded conv1/conv2 weight construction.
    _check_banded_construction(torch_params)

    fwd = jax.jit(cnn_forward, static_argnames=("tb",))

    # Small case (single 128-wide block), a forced 2-block case, and a case
    # exercising the automatic tile policy (tb=384, grid=(2,)).
    for B, tb in ((8, None), (200, 128), (700, None)):
        x = jax.random.normal(jax.random.fold_in(kx, B), (B, L), jnp.float32)
        out = jax.block_until_ready(fwd(x, kernel_params, tb=tb))
        ref = reference_forward(x, torch_params)
        out_np, ref_np = np.asarray(out), np.asarray(ref)
        # bf16 matmul inputs with fp32 accumulation; exact sigmoid.
        if out_np.shape != ref_np.shape or not np.allclose(
                out_np, ref_np, rtol=1e-2, atol=1e-2):
            raise AssertionError(
                f"Pallas kernel mismatch vs reference at B={B}: max abs err "
                f"{np.max(np.abs(out_np - ref_np))}")
    print("KERNEL_OK")
</pallas_src>

<mosaic_0001>
module attributes {stable_mosaic.version = 11 : i64} {
  func.func @_cnn_kernel(%arg0: i32, %arg1: memref<16x128xbf16, #tpu.memory_space<vmem>>, %arg2: memref<176x16xbf16, #tpu.memory_space<vmem>>, %arg3: memref<352x176xbf16, #tpu.memory_space<vmem>>, %arg4: memref<352x1xf32, #tpu.memory_space<vmem>>, %arg5: memref<64x352xbf16, #tpu.memory_space<vmem>>, %arg6: memref<64x1xf32, #tpu.memory_space<vmem>>, %arg7: memref<64x1xf32, #tpu.memory_space<vmem>>, %arg8: memref<1x1xf32, #tpu.memory_space<vmem>>, %arg9: memref<1x128xf32, #tpu.memory_space<vmem>>) attributes {dimension_semantics = [#tpu.dimension_semantics<parallel>], iteration_bounds = array<i64: 1>, scalar_prefetch = 0 : i64, scratch_operands = 0 : i64, tpu.core_type = #tpu.core_type<tc>, window_params = [{transform_indices = @transform_0, window_bounds = array<i64: 16, 128>}, {pipeline_mode = #tpu.pipeline_mode<synchronous>, transform_indices = @transform_1, window_bounds = array<i64: 176, 16>}, {pipeline_mode = #tpu.pipeline_mode<synchronous>, transform_indices = @transform_2, window_bounds = array<i64: 352, 176>}, {pipeline_mode = #tpu.pipeline_mode<synchronous>, transform_indices = @transform_3, window_bounds = array<i64: 352, 1>}, {pipeline_mode = #tpu.pipeline_mode<synchronous>, transform_indices = @transform_4, window_bounds = array<i64: 64, 352>}, {pipeline_mode = #tpu.pipeline_mode<synchronous>, transform_indices = @transform_5, window_bounds = array<i64: 64, 1>}, {pipeline_mode = #tpu.pipeline_mode<synchronous>, transform_indices = @transform_6, window_bounds = array<i64: 64, 1>}, {pipeline_mode = #tpu.pipeline_mode<synchronous>, transform_indices = @transform_7, window_bounds = array<i64: 1, 1>}, {transform_indices = @transform_8, window_bounds = array<i64: 1, 128>}]} {
    %c0 = arith.constant 0 : index
    %c0_0 = arith.constant 0 : index
    %0 = vector.load %arg1[%c0, %c0_0] : memref<16x128xbf16, #tpu.memory_space<vmem>>, vector<16x128xbf16>
    %c0_1 = arith.constant 0 : index
    %c0_2 = arith.constant 0 : index
    %1 = vector.load %arg2[%c0_1, %c0_2] : memref<176x16xbf16, #tpu.memory_space<vmem>>, vector<176x16xbf16>
    %cst = arith.constant dense<0.000000e+00> : vector<176x128xf32>
    %2 = tpu.matmul %1, %0, %cst {dimension_numbers = #tpu.dot_dimension_numbers<[1], [0], [0], [1], [0, 0, 1, 1], [], []>} : vector<176x16xbf16>, vector<16x128xbf16>, vector<176x128xf32> -> vector<176x128xf32>
    %cst_3 = arith.constant 0.000000e+00 : f32
    %3 = vector.broadcast %cst_3 : f32 to vector<176x128xf32>
    %4 = arith.maximumf %2, %3 : vector<176x128xf32>
    %c0_4 = arith.constant 0 : index
    %c0_5 = arith.constant 0 : index
    %5 = vector.load %arg3[%c0_4, %c0_5] : memref<352x176xbf16, #tpu.memory_space<vmem>>, vector<352x176xbf16>
    %6 = arith.truncf %4 : vector<176x128xf32> to vector<176x128xbf16>
    %cst_6 = arith.constant dense<0.000000e+00> : vector<352x128xf32>
    %7 = tpu.matmul %5, %6, %cst_6 {dimension_numbers = #tpu.dot_dimension_numbers<[1], [0], [0], [1], [0, 0, 1, 1], [], []>} : vector<352x176xbf16>, vector<176x128xbf16>, vector<352x128xf32> -> vector<352x128xf32>
    %c0_7 = arith.constant 0 : index
    %c0_8 = arith.constant 0 : index
    %8 = vector.load %arg4[%c0_7, %c0_8] : memref<352x1xf32, #tpu.memory_space<vmem>>, vector<352x1xf32>
    %9 = vector.broadcast %8 : vector<352x1xf32> to vector<352x128xf32>
    %10 = arith.addf %7, %9 : vector<352x128xf32>
    %cst_9 = arith.constant 0.000000e+00 : f32
    %11 = vector.broadcast %cst_9 : f32 to vector<352x128xf32>
    %12 = arith.maximumf %10, %11 : vector<352x128xf32>
    %c0_10 = arith.constant 0 : index
    %c0_11 = arith.constant 0 : index
    %13 = vector.load %arg5[%c0_10, %c0_11] : memref<64x352xbf16, #tpu.memory_space<vmem>>, vector<64x352xbf16>
    %14 = arith.truncf %12 : vector<352x128xf32> to vector<352x128xbf16>
    %cst_12 = arith.constant dense<0.000000e+00> : vector<64x128xf32>
    %15 = tpu.matmul %13, %14, %cst_12 {dimension_numbers = #tpu.dot_dimension_numbers<[1], [0], [0], [1], [0, 0, 1, 1], [], []>} : vector<64x352xbf16>, vector<352x128xbf16>, vector<64x128xf32> -> vector<64x128xf32>
    %c0_13 = arith.constant 0 : index
    %c0_14 = arith.constant 0 : index
    %16 = vector.load %arg6[%c0_13, %c0_14] : memref<64x1xf32, #tpu.memory_space<vmem>>, vector<64x1xf32>
    %17 = vector.broadcast %16 : vector<64x1xf32> to vector<64x128xf32>
    %18 = arith.addf %15, %17 : vector<64x128xf32>
    %cst_15 = arith.constant 0.000000e+00 : f32
    %19 = vector.broadcast %cst_15 : f32 to vector<64x128xf32>
    %20 = arith.maximumf %18, %19 : vector<64x128xf32>
    %c0_16 = arith.constant 0 : index
    %c0_17 = arith.constant 0 : index
    %21 = vector.load %arg7[%c0_16, %c0_17] : memref<64x1xf32, #tpu.memory_space<vmem>>, vector<64x1xf32>
    %22 = vector.broadcast %21 : vector<64x1xf32> to vector<64x128xf32>
    %23 = arith.mulf %20, %22 : vector<64x128xf32>
    %cst_18 = arith.constant dense<0.000000e+00> : vector<128xf32>
    %24 = vector.multi_reduction <add>, %23, %cst_18 [0] : vector<64x128xf32> to vector<128xf32>
    %25 = vector.shape_cast %24 : vector<128xf32> to vector<1x128xf32>
    %c0_19 = arith.constant 0 : index
    %c0_20 = arith.constant 0 : index
    %26 = vector.load %arg8[%c0_19, %c0_20] : memref<1x1xf32, #tpu.memory_space<vmem>>, vector<1x1xf32>
    %27 = vector.broadcast %26 : vector<1x1xf32> to vector<1x128xf32>
    %28 = arith.addf %25, %27 : vector<1x128xf32>
    %cst_21 = arith.constant 0.000000e+00 : f32
    %29 = vector.broadcast %cst_21 : f32 to vector<1x128xf32>
    %30 = arith.subf %29, %28 : vector<1x128xf32>
    %31 = math.exp %30 : vector<1x128xf32>
    %cst_22 = arith.constant 1.000000e+00 : f32
    %32 = vector.broadcast %cst_22 : f32 to vector<1x128xf32>
    %33 = arith.addf %32, %31 : vector<1x128xf32>
    %cst_23 = arith.constant 1.000000e+00 : f32
    %34 = vector.broadcast %cst_23 : f32 to vector<1x128xf32>
    %35 = arith.divf %34, %33 : vector<1x128xf32>
    %c0_24 = arith.constant 0 : index
    %c0_25 = arith.constant 0 : index
    %36 = vector.load %arg9[%c0_24, %c0_25] : memref<1x128xf32, #tpu.memory_space<vmem>>, vector<1x128xf32>
    tpu.vector_store %arg9[%c0_24, %c0_25], %35 {strides = array<i32>} : memref<1x128xf32, #tpu.memory_space<vmem>>, vector<1x128xf32>,
    return
  }
  func.func @transform_0(%arg0: i32) -> (i32, i32) {
    %c0_i32 = arith.constant 0 : i32
    %c0_i32_0 = arith.constant 0 : i32
    return %c0_i32, %arg0 : i32, i32
  }
  func.func @transform_1(%arg0: i32) -> (i32, i32) {
    %c0_i32 = arith.constant 0 : i32
    %c0_i32_0 = arith.constant 0 : i32
    %c0_i32_1 = arith.constant 0 : i32
    return %c0_i32, %c0_i32_0 : i32, i32
  }
  func.func @transform_2(%arg0: i32) -> (i32, i32) {
    %c0_i32 = arith.constant 0 : i32
    %c0_i32_0 = arith.constant 0 : i32
    %c0_i32_1 = arith.constant 0 : i32
    return %c0_i32, %c0_i32_0 : i32, i32
  }
  func.func @transform_3(%arg0: i32) -> (i32, i32) {
    %c0_i32 = arith.constant 0 : i32
    %c0_i32_0 = arith.constant 0 : i32
    %c0_i32_1 = arith.constant 0 : i32
    return %c0_i32, %c0_i32_0 : i32, i32
  }
  func.func @transform_4(%arg0: i32) -> (i32, i32) {
    %c0_i32 = arith.constant 0 : i32
    %c0_i32_0 = arith.constant 0 : i32
    %c0_i32_1 = arith.constant 0 : i32
    return %c0_i32, %c0_i32_0 : i32, i32
  }
  func.func @transform_5(%arg0: i32) -> (i32, i32) {
    %c0_i32 = arith.constant 0 : i32
    %c0_i32_0 = arith.constant 0 : i32
    %c0_i32_1 = arith.constant 0 : i32
    return %c0_i32, %c0_i32_0 : i32, i32
  }
  func.func @transform_6(%arg0: i32) -> (i32, i32) {
    %c0_i32 = arith.constant 0 : i32
    %c0_i32_0 = arith.constant 0 : i32
    %c0_i32_1 = arith.constant 0 : i32
    return %c0_i32, %c0_i32_0 : i32, i32
  }
  func.func @transform_7(%arg0: i32) -> (i32, i32) {
    %c0_i32 = arith.constant 0 : i32
    %c0_i32_0 = arith.constant 0 : i32
    %c0_i32_1 = arith.constant 0 : i32
    return %c0_i32, %c0_i32_0 : i32, i32
  }
  func.func @transform_8(%arg0: i32) -> (i32, i32) {
    %c0_i32 = arith.constant 0 : i32
    %c0_i32_0 = arith.constant 0 : i32
    return %c0_i32, %arg0 : i32, i32
  }
}

</mosaic_0001>

<bundles_post_ra>
// kernel: cnn_forward.1
= control target key start
LH: loop header
LB: loop body
LE: loop exit
PB: predicated region body
PF: predicated region fallthrough
CT: control target
= control target key end

     0   :  { %v1877_v0 = vmov 0.0   ;;  %vm1878_vm0 = vmmov 0   ;;  %vm117_vm1 = vcmask 130048   ;;  %v1879_v13 = vmov 0   ;;  %s2539_s0 = inlined_call_operand.vmem [shape: bf16[16,128], index: 0, kind: input, shape index: {}]   ;;  %s2540_s1 = inlined_call_operand.vmem [shape: bf16[176,16], index: 1, kind: input, shape index: {}]   ;;  %s2541_s2 = inlined_call_operand.vmem [shape: bf16[352,176], index: 2, kind: input, shape index: {}]   ;;  %s2542_s3 = inlined_call_operand.vmem [shape: f32[352,1], index: 3, kind: input, shape index: {}]   ;;  %s2543_s5 = inlined_call_operand.vmem [shape: f32[64,1], index: 5, kind: input, shape index: {}]   ;;  %s2544_s6 = inlined_call_operand.vmem [shape: f32[64,1], index: 6, kind: input, shape index: {}]   ;;  %s2545_s7 = inlined_call_operand.<no memory space> [shape: f32[1,1], index: 7, kind: input, shape index: {}]   ;;  %s2546_s4 = inlined_call_operand.vmem [shape: bf16[64,352], index: 4, kind: input, shape index: {}]   ;;  %s2547_s8 = inlined_call_operand.vmem [shape: f32[1,128], index: 8, kind: output, shape index: {}]  }
   0x1   :  { %1686 = vmatprep.subr.bf16.mxu0 %v1877_v0  ;;  %v1779_v1 = vld [vmem:[%s2539_s0] sm:$0xff]   ;;  %1688 = vmatprep.mubr.msk.bf16.mxu0 %vm1878_vm0, %v1877_v0  ;;  %v1781_v3 = vld [vmem:[%s2540_s1 + $0x8] sm:$0xff]   ;;  %v1782_v4 = vld [vmem:[%s2540_s1 + $0x10] sm:$0xff]   ;;  %vm811_vm2 = vcmask 392192   ;;  %vm1277_vm3 = vcmask 785408  }
   0x2   :  { %v1780_v2 = vld [vmem:[%s2540_s1] sm:$0xff]   ;;  %1687 = vmatpush3.bf16.msra.mxu0 %v1779_v1  ;;  %v1783_v5 = vld [vmem:[%s2540_s1 + $0x18] sm:$0xff]   ;;  %v1785_v7 = vld [vmem:[%s2540_s1 + $0x28] sm:$0xff]   ;;  %1752 = vmatprep.subr.bf16.mxu1 %v1879_v13 }
   0x3   :  { %v1784_v6 = vld [vmem:[%s2540_s1 + $0x20] sm:$0xff]   ;;  %v1786_v8 = vld [vmem:[%s2540_s1 + $0x30] sm:$0xff]   ;;  %v1787_v9 = vld [vmem:[%s2540_s1 + $0x38] sm:$0xff]   ;;  %878 = vmatprep.subr.bf16.mxu0 %v1879_v13  ;;  %1777 = vset.pattern.permute.xlu0 %v1879_v13 }
   0x4   :  { %v1788_v10 = vld [vmem:[%s2540_s1 + $0x40] sm:$0xff]   ;;  %v1789_v11 = vld [vmem:[%s2540_s1 + $0x48] sm:$0xff]   ;;  %v1790_v12 = vld [vmem:[%s2540_s1 + $0x50] sm:$0xff]   ;;  %1778 = vset.pattern.permute.xlu1 %v1879_v13 }
   0x5   :  { %1689 = vmatmul.mubr.msk.bf16.vlgmr.msra.gmra.mxu0 %vm117_vm1, %v1780_v2  ;;  %v1793_v14 = vld [vmem:[%s2541_s2 + $0x54] ss:$8 sps:$4 sm:$0xff]   ;;  %v377_v18 = vld [vmem:[%s2542_s3 + $0xe0] sm:$0xff]  ;;  %v378_v21 = vld [vmem:[%s2542_s3 + $0xe8] sm:$0xff] }
   0x6   :  { %1692 = vmatprep.mubr.msk.bf16.mxu0 %vm1878_vm0, %v1877_v0  ;;  %1591 = vmatprep.mubr.msk.bf16.mxu1 %vm811_vm2, %v1793_v14  ;;  %v379_v15 = vld [vmem:[%s2542_s3 + $0xf0] sm:$0xff]  ;;  %v380_v16 = vld [vmem:[%s2542_s3 + $0xf8] sm:$0xff]  ;;  %v361_v22 = vld [vmem:[%s2542_s3 + $0x60] sm:$0xff] }
   0x7   :  { %545 = vperm.xlu0 %1777, %v379_v15   ;;  %v363_v17 = vld [vmem:[%s2542_s3 + $0x70] sm:$0xff]  ;;  %v364_v19 = vld [vmem:[%s2542_s3 + $0x78] sm:$0xff]  ;;  %v1805_v24 = vld [vmem:[%s2541_s2 + $0x4] ss:$8 sps:$4 sm:$0xff]  }
   0x8   :  { %465 = vperm.xlu1 %1778, %v363_v17   ;;  %v362_v28 = vld [vmem:[%s2542_s3 + $0x68] sm:$0xff]  ;;  %v375_v29 = vld [vmem:[%s2542_s3 + $0xd0] sm:$0xff]  ;;  %v376_v33 = vld [vmem:[%s2542_s3 + $0xd8] sm:$0xff] }
   0x9   :  { %v359_v34 = vld [vmem:[%s2542_s3 + $0x50] sm:$0xff]  ;;  %v360_v39 = vld [vmem:[%s2542_s3 + $0x58] sm:$0xff]  ;;  %v373_v40 = vld [vmem:[%s2542_s3 + $0xc0] sm:$0xff] }
   0xa   :  { %v374_v44 = vld [vmem:[%s2542_s3 + $0xc8] sm:$0xff]  ;;  %v357_v45 = vld [vmem:[%s2542_s3 + $0x40] sm:$0xff]  ;;  %v371_v49 = vld [vmem:[%s2542_s3 + $0xb0] sm:$0xff] }
   0xb   :  { %550 = vperm.xlu0 %1777, %v380_v16   ;;  %v358_v48 = vld [vmem:[%s2542_s3 + $0x48] sm:$0xff]  ;;  %v372_v52 = vld [vmem:[%s2542_s3 + $0xb8] sm:$0xff]  ;;  %v355_v53 = vld [vmem:[%s2542_s3 + $0x30] sm:$0xff] }
   0xc   :  { %470 = vperm.xlu1 %1778, %v364_v19   ;;  %v356_v56 = vld [vmem:[%s2542_s3 + $0x38] sm:$0xff]  ;;  %v369_v57 = vld [vmem:[%s2542_s3 + $0xa0] sm:$0xff]  ;;  %v370_v60 = vld [vmem:[%s2542_s3 + $0xa8] sm:$0xff] }
   0xd   :  { %1693 = vmatmul.mubr.msk.bf16.gmra.mxu0 %vm117_vm1, %v1781_v3  ;;  %v353_v61 = vld [vmem:[%s2542_s3 + $0x20] sm:$0xff]  ;;  %v367_v1 = vld [vmem:[%s2542_s3 + $0x90] sm:$0xff]  ;;  %v350_v17 = vld [vmem:[%s2542_s3 + $0x8] sm:$0xff] }
   0xe   :  { %1696 = vmatprep.mubr.msk.bf16.mxu0 %vm1878_vm0, %v1877_v0  ;;  %v349_v14 = vld [vmem:[%s2542_s3] sm:$0xff] }
   0xf   :  { %535 = vperm.xlu0 %1777, %v377_v18   ;;  %v391_v18 = vld [vmem:[%s2542_s3 + $0x150] sm:$0xff] }
  0x10   :  { %540 = vperm.xlu1 %1778, %v378_v21   ;;  %v392_v21 = vld [vmem:[%s2542_s3 + $0x158] sm:$0xff] }
  0x13   :  { %455 = vperm.xlu0 %1777, %v361_v22   ;;  %v389_v22 = vld [vmem:[%s2542_s3 + $0x140] sm:$0xff] }
  0x14   :  { %460 = vperm.xlu1 %1778, %v362_v28   ;;  %v387_v28 = vld [vmem:[%s2542_s3 + $0x130] sm:$0xff] }
  0x15   :  { %1697 = vmatmul.mubr.msk.bf16.gmra.mxu0 %vm117_vm1, %v1782_v4  ;;  %v368_v4 = vld [vmem:[%s2542_s3 + $0x98] sm:$0xff] }
  0x16   :  { %1700 = vmatprep.mubr.msk.bf16.mxu0 %vm1878_vm0, %v1877_v0 }
  0x17   :  { %525 = vperm.xlu0 %1777, %v375_v29  }
  0x18   :  { %530 = vperm.xlu1 %1778, %v376_v33  }
  0x1b   :  { %445 = vperm.xlu0 %1777, %v359_v34  }
  0x1c   :  { %450 = vperm.xlu1 %1778, %v360_v39  }
  0x1d   :  { %1701 = vmatmul.mubr.msk.bf16.gmra.mxu0 %vm117_vm1, %v1783_v5  ;;  %v351_v5 = vld [vmem:[%s2542_s3 + $0x10] sm:$0xff] }
  0x1e   :  { %1704 = vmatprep.mubr.msk.bf16.mxu0 %vm1878_vm0, %v1877_v0 }
  0x1f   :  { %515 = vperm.xlu0 %1777, %v373_v40  }
  0x20   :  { %520 = vperm.xlu1 %1778, %v374_v44   ;;  %v386_v44 = vld [vmem:[%s2542_s3 + $0x128] sm:$0xff] }
  0x23   :  { %435 = vperm.xlu0 %1777, %v357_v45   ;;  %v383_v45 = vld [vmem:[%s2542_s3 + $0x110] sm:$0xff] }
  0x24   :  { %440 = vperm.xlu1 %1778, %v358_v48  }
  0x25   :  { %1705 = vmatmul.mubr.msk.bf16.gmra.mxu0 %vm117_vm1, %v1784_v6 }
  0x26   :  { %1708 = vmatprep.mubr.msk.bf16.mxu0 %vm1878_vm0, %v1877_v0 }
  0x27   :  { %505 = vperm.xlu0 %1777, %v371_v49  }
  0x28   :  { %510 = vperm.xlu1 %1778, %v372_v52  }
  0x2b   :  { %425 = vperm.xlu0 %1777, %v355_v53   ;;  %v384_v53 = vld [vmem:[%s2542_s3 + $0x118] sm:$0xff] }
  0x2c   :  { %430 = vperm.xlu1 %1778, %v356_v56  }
  0x2d   :  { %1709 = vmatmul.mubr.msk.bf16.gmra.mxu0 %vm117_vm1, %v1785_v7 }
  0x2e   :  { %1712 = vmatprep.mubr.msk.bf16.mxu0 %vm1878_vm0, %v1877_v0 }
  0x2f   :  { %495 = vperm.xlu0 %1777, %v369_v57  }
  0x30   :  { %500 = vperm.xlu1 %1778, %v370_v60  }
  0x33   :  { %415 = vperm.xlu0 %1777, %v353_v61   ;;  %v382_v61 = vld [vmem:[%s2542_s3 + $0x108] sm:$0xff] }
  0x35   :  { %1713 = vmatmul.mubr.msk.bf16.gmra.mxu0 %vm117_vm1, %v1786_v8  ;;  %v352_v8 = vld [vmem:[%s2542_s3 + $0x18] sm:$0xff] }
  0x36   :  { %1716 = vmatprep.mubr.msk.bf16.mxu0 %vm1878_vm0, %v1877_v0 }
  0x37   :  { %485 = vperm.xlu0 %1777, %v367_v1  }
  0x3b   :  { %405 = vperm.xlu0 %1777, %v351_v5  }
  0x3d   :  { %1717 = vmatmul.mubr.msk.bf16.gmra.mxu0 %vm117_vm1, %v1787_v9  ;;  %v365_v9 = vld [vmem:[%s2542_s3 + $0x80] sm:$0xff] }
  0x3e   :  { %1720 = vmatprep.mubr.msk.bf16.mxu0 %vm1878_vm0, %v1877_v0 }
  0x3f   :  { %475 = vperm.xlu0 %1777, %v365_v9   ;;  %v1429_v9 = vld [vmem:[%s2544_s6 + $0x8] sm:$0xff] }
  0x43   :  { %395 = vperm.xlu0 %1777, %v349_v14  }
  0x45   :  { %1721 = vmatmul.mubr.msk.bf16.gmra.mxu0 %vm117_vm1, %v1788_v10 }
  0x46   :  { %1724 = vmatprep.mubr.msk.bf16.mxu0 %vm1878_vm0, %v1877_v0 }
  0x47   :  { %605 = vperm.xlu0 %1777, %v391_v18  }
  0x4b   :  { %595 = vperm.xlu0 %1777, %v389_v22   ;;  %v1432_v22 = vld [vmem:[%s2544_s6 + $0x20] sm:$0xff] }
  0x4d   :  { %1725 = vmatmul.mubr.msk.bf16.gmra.mxu0 %vm117_vm1, %v1789_v11 }
  0x4e   :  { %1728 = vmatprep.mubr.msk.bf16.mxu0 %vm1878_vm0, %v1877_v0  ;;  %v354_v0 = vld [vmem:[%s2542_s3 + $0x28] sm:$0xff] }
  0x4f   :  { %420 = vperm.xlu1 %1778, %v354_v0   ;;  %585 = vperm.xlu0 %1777, %v387_v28   ;;  %v1433_v28 = vld [vmem:[%s2544_s6 + $0x28] sm:$0xff] }
  0x53   :  { %490 = vperm.xlu1 %1778, %v368_v4  }
  0x55   :  { %1729 = vmatmul.mubr.msk.bf16.gmra.mxu0 %vm117_vm1, %v1790_v12  ;;  %v366_v12 = vld [vmem:[%s2542_s3 + $0x88] sm:$0xff] }
  0x56   :  { %1586 = vmatprep.mubr.msk.bf16.mxu0 %vm811_vm2, %v1805_v24 }
  0x57   :  { %410 = vperm.xlu1 %1778, %v352_v8   ;;  %v1428_v8 = vld [vmem:[%s2544_s6] sm:$0xff] }
  0x5b   :  { %480 = vperm.xlu1 %1778, %v366_v12   ;;  %v1430_v12 = vld [vmem:[%s2544_s6 + $0x10] sm:$0xff] }
  0x5f   :  { %400 = vperm.xlu1 %1778, %v350_v17   ;;  %v1431_v17 = vld [vmem:[%s2544_s6 + $0x18] sm:$0xff] }
  0x63   :  { %610 = vperm.xlu1 %1778, %v392_v21   ;;  %v1176_v21 = vld [vmem:[%s2543_s5 + $0x38] sm:$0xff] }
  0xc5   :  { %v185_v20 = vpop.f32.mrf.mxu0 }
  0xc6   :  { %v272_v26 = vmax.f32 %v185_v20, 0.0 }
  0xc7   :  { %v1690_v23 = vpop.f32.mrf.mxu0 }
  0xc9   :  { %v188_v25 = vpop.f32.mrf.mxu0 }
  0xca   :  { %v273_v27 = vmax.f32 %v188_v25, 0.0 }
  0xcb   :  { %v1691_v30 = vpop.f32.mrf.mxu0 }
  0xcc   :  { %v2022_v31 = vpack.c.bf16 %v273_v27, %v272_v26  ;;  %v390_v27 = vld [vmem:[%s2542_s3 + $0x148] sm:$0xff] }
  0xcd   :  { %v193_v32 = vpop.f32.mrf.mxu0  ;;  %600 = vperm.xlu1 %1778, %v390_v27   ;;  %v1803_v27 = vld [vmem:[%s2541_s2] ss:$8 sps:$4 sm:$0xff]  }
  0xce   :  { %v274_v37 = vmax.f32 %v193_v32, 0.0 }
  0xcf   :  { %v1694_v35 = vpop.f32.mrf.mxu0 }
  0xd0   :  { %v388_v35 = vld [vmem:[%s2542_s3 + $0x138] sm:$0xff] }
  0xd1   :  { %v196_v36 = vpop.f32.mrf.mxu0  ;;  %590 = vperm.xlu1 %1778, %v388_v35   ;;  %v1797_v35 = vld [vmem:[%s2541_s2 + $0x74] ss:$8 sps:$4 sm:$0xff]  }
  0xd2   :  { %v275_v38 = vmax.f32 %v196_v36, 0.0  ;;  %v385_v36 = vld [vmem:[%s2542_s3 + $0x120] sm:$0xff] }
  0xd3   :  { %v1695_v41 = vpop.f32.mrf.mxu0  ;;  %575 = vperm.xlu0 %1777, %v385_v36   ;;  %v1815_v36 = vld [vmem:[%s2541_s2 + $0x24] ss:$8 sps:$4 sm:$0xff]  }
  0xd4   :  { %v2036_v42 = vpack.c.bf16 %v275_v38, %v274_v37 }
  0xd5   :  { %v2038_v43 = vpop.f32.mrf.mxu0  ;;  %580 = vperm.xlu1 %1778, %v386_v44   ;;  %v1825_v44 = vld [vmem:[%s2541_s2 + $0x30] ss:$8 sps:$4 sm:$0xff]  }
  0xd6   :  { %v276_v1 = vmax.f32 %v2038_v43, 0.0  ;;  %v1172_v43 = vld [vmem:[%s2543_s5 + $0x18] sm:$0xff] }
  0xd7   :  { %v1698_v46 = vpop.f32.mrf.mxu0  ;;  %565 = vperm.xlu0 %1777, %v383_v45   ;;  %v1806_v45 = vld [vmem:[%s2541_s2 + $0x94] ss:$8 sps:$4 sm:$0xff]  }
  0xd9   :  { %v2046_v47 = vpop.f32.mrf.mxu0  ;;  %570 = vperm.xlu1 %1778, %v384_v53   ;;  %v1817_v53 = vld [vmem:[%s2541_s2 + $0xb4] ss:$8 sps:$4 sm:$0xff]  }
  0xdb   :  { %v1699_v50 = vpop.f32.mrf.mxu0 }
  0xdd   :  { %v2054_v51 = vpop.f32.mrf.mxu0  ;;  %560 = vperm.xlu1 %1778, %v382_v61   ;;  %v1835_v61 = vld [vmem:[%s2541_s2 + $0xe0] ss:$8 sps:$4 sm:$0xff]  }
  0xde   :  { %v278_v60 = vmax.f32 %v2054_v51, 0.0 }
  0xdf   :  { %v1702_v54 = vpop.f32.mrf.mxu0 }
  0xe0   :  { %v381_v54 = vld [vmem:[%s2542_s3 + $0x100] sm:$0xff] }
  0xe1   :  { %v2062_v55 = vpop.f32.mrf.mxu0  ;;  %555 = vperm.xlu0 %1777, %v381_v54   ;;  %v1820_v54 = vld [vmem:[%s2541_s2 + $0xb0] ss:$8 sps:$4 sm:$0xff]  }
  0xe2   :  { %v279_v57 = vmax.f32 %v2062_v55, 0.0  ;;  %v277_v55 = vmax.f32 %v2046_v47, 0.0 }
  0xe3   :  { %v1703_v58 = vpop.f32.mrf.mxu0 }
  0xe4   :  { %v341_v0 = vpack.c.bf16 %v279_v57, %v278_v60  ;;  %v340_v47 = vpack.c.bf16 %v277_v55, %v276_v1  ;;  %v1826_v57 = vld [vmem:[%s2541_s2 + $0xc0] ss:$8 sps:$4 sm:$0xff]   ;;  %v1833_v60 = vld [vmem:[%s2541_s2 + $0xe4] ss:$8 sps:$4 sm:$0xff]   ;;  %v1844_v1 = vld [vmem:[%s2541_s2 + $0x110] ss:$8 sps:$4 sm:$0xff]  }
  0xe5   :  { %v2070_v59 = vpop.f32.mrf.mxu0  ;;  %v1839_v55 = vld [vmem:[%s2541_s2 + $0x104] ss:$8 sps:$4 sm:$0xff]  }
  0xe6   :  { %v280_v52 = vmax.f32 %v2070_v59, 0.0 }
  0xe7   :  { %v1706_v62 = vpop.f32.mrf.mxu0 }
  0xe8   :  { %v1169_v62 = vld [vmem:[%s2543_s5] sm:$0xff] }
  0xe9   :  { %v2078_v63 = vpop.f32.mrf.mxu0  ;;  %1179 = vperm.xlu0 %1777, %v1169_v62   ;;  %v1836_v62 = vld [vmem:[%s2541_s2 + $0xf4] ss:$8 sps:$4 sm:$0xff]  }
  0xea   :  { %v281_v48 = vmax.f32 %v2078_v63, 0.0 }
  0xeb   :  { %v1707_v2 = vpop.f32.mrf.mxu0 }
  0xec   :  { %v342_v58 = vpack.c.bf16 %v281_v48, %v280_v52  ;;  %v1170_v2 = vld [vmem:[%s2543_s5 + $0x8] sm:$0xff]  ;;  %v1808_v48 = vld [vmem:[%s2541_s2 + $0x90] ss:$8 sps:$4 sm:$0xff]  }
  0xed   :  { %v2086_v3 = vpop.f32.mrf.mxu0  ;;  %1184 = vperm.xlu1 %1778, %v1170_v2   ;;  %v1814_v52 = vld [vmem:[%s2541_s2 + $0xa0] ss:$8 sps:$4 sm:$0xff]   ;;  %v1845_v2 = vld [vmem:[%s2541_s2 + $0x124] ss:$8 sps:$4 sm:$0xff]  }
  0xee   :  { %v282_v41 = vmax.f32 %v2086_v3, 0.0  ;;  %v1171_v3 = vld [vmem:[%s2543_s5 + $0x10] sm:$0xff] }
  0xef   :  { %v1710_v6 = vpop.f32.mrf.mxu0  ;;  %1189 = vperm.xlu0 %1777, %v1171_v3   ;;  %v1847_v3 = vld [vmem:[%s2541_s2 + $0x120] ss:$8 sps:$4 sm:$0xff]  }
  0xf0   :  { %v1173_v6 = vld [vmem:[%s2543_s5 + $0x20] sm:$0xff] }
  0xf1   :  { %v228_v7 = vpop.f32.mrf.mxu0  ;;  %1194 = vperm.xlu1 %1778, %v1172_v43  }
  0xf2   :  { %v283_v38 = vmax.f32 %v228_v7, 0.0 }
  0xf3   :  { %v1711_v10 = vpop.f32.mrf.mxu0  ;;  %1199 = vperm.xlu0 %1777, %v1173_v6   ;;  %v1850_v6 = vld [vmem:[%s2541_s2 + $0x130] ss:$8 sps:$4 sm:$0xff]  }
  0xf4   :  { %v343_v49 = vpack.c.bf16 %v283_v38, %v282_v41  ;;  %v1819_v38 = vld [vmem:[%s2541_s2 + $0x20] ss:$8 sps:$4 sm:$0xff]  }
  0xf5   :  { %v233_v11 = vpop.f32.mrf.mxu0  ;;  %1438 = vperm.xlu1 %1778, %v1428_v8   ;;  %v1802_v41 = vld [vmem:[%s2541_s2 + $0x80] ss:$8 sps:$4 sm:$0xff]  }
  0xf6   :  { %v284_v34 = vmax.f32 %v233_v11, 0.0 }
  0xf7   :  { %v1714_v15 = vpop.f32.mrf.mxu0  ;;  %1443 = vperm.xlu0 %1777, %v1429_v9  }
  0xf9   :  { %v236_v16 = vpop.f32.mrf.mxu0 }
  0xfa   :  { %v285_v30 = vmax.f32 %v236_v16, 0.0 }
  0xfb   :  { %v1715_v19 = vpop.f32.mrf.mxu0  ;;  %1448 = vperm.xlu0 %1777, %v1430_v12  }
  0xfc   :  { %v344_v39 = vpack.c.bf16 %v285_v30, %v284_v34  ;;  %v1435_v30 = vld [vmem:[%s2544_s6 + $0x38] sm:$0xff] }
  0xfd   :  { %v241_v20 = vpop.f32.mrf.mxu0  ;;  %v1813_v34 = vld [vmem:[%s2541_s2 + $0x10] ss:$8 sps:$4 sm:$0xff]  }
  0xfe   :  { %v286_v25 = vmax.f32 %v241_v20, 0.0 }
  0xff   :  { %v1718_v23 = vpop.f32.mrf.mxu0  ;;  %1453 = vperm.xlu0 %1777, %v1431_v17  }
 0x100   :  { %v13_v23 = vstv %s2545_s7 }
 0x101   :  { %v244_v24 = vpop.f32.mrf.mxu0  ;;  %14 = vst [vmem:[#allocation2] sm:$0x1] %v13_v23 }
 0x102   :  { %v287_v26 = vmax.f32 %v244_v24, 0.0 }
 0x103   :  { %v1719_v29 = vpop.f32.mrf.mxu0  ;;  %1458 = vperm.xlu0 %1777, %v1432_v22  }
 0x104   :  { %v345_v32 = vpack.c.bf16 %v287_v26, %v286_v25  ;;  %v1791_v25 = vld [vmem:[%s2541_s2 + $0x50] ss:$8 sps:$4 sm:$0xff]   ;;  %v1794_v26 = vld [vmem:[%s2541_s2 + $0x64] ss:$8 sps:$4 sm:$0xff]  }
 0x105   :  { %v2124_v33 = vpop.f32.mrf.mxu0  ;;  %v1434_v29 = vld [vmem:[%s2544_s6 + $0x30] sm:$0xff] }
 0x106   :  { %879 = vmatpush1.bf16.msra.mxu0 %v345_v32  ;;  %1763 = vmatpush1.bf16.msra.mxu1 %v345_v32  ;;  %v288_v18 = vmax.f32 %v2124_v33, 0.0  ;;  %v1796_v33 = vld [vmem:[%s2541_s2 + $0x60] ss:$8 sps:$4 sm:$0xff]  }
 0x107   :  { %v1722_v37 = vpop.f32.mrf.mxu0  ;;  %880 = vmatprep.subr.bf16.mxu0 %v1879_v13  ;;  %1753 = vmatprep.subr.bf16.mxu1 %v1879_v13 }
 0x108   :  { %1468 = vperm.xlu0 %1777, %v1434_v29   ;;  %v1497_v32 = vld [vmem:[#allocation2] sm:$0x1]  ;;  %v1799_v37 = vld [vmem:[%s2541_s2 + $0x70] ss:$8 sps:$4 sm:$0xff]  }
 0x109   :  { %v2134_v40 = vpop.f32.mrf.mxu0 }
 0x10a   :  { %881 = vmatpush1.bf16.msra.mxu0 %v344_v39  ;;  %1764 = vmatpush1.bf16.msra.mxu1 %v344_v39  ;;  %v289_v19 = vmax.f32 %v2134_v40, 0.0  ;;  %v1800_v39 = vld [vmem:[%s2541_s2 + $0x84] ss:$8 sps:$4 sm:$0xff]   ;;  %v1821_v40 = vld [vmem:[%s2541_s2 + $0x34] ss:$8 sps:$4 sm:$0xff]  }
 0x10b   :  { %v1723_v46 = vpop.f32.mrf.mxu0  ;;  %882 = vmatprep.subr.bf16.mxu0 %v1879_v13  ;;  %1754 = vmatprep.subr.bf16.mxu1 %v1879_v13 }
 0x10c   :  { %v346_v24 = vpack.c.bf16 %v289_v19, %v288_v18  ;;  %1500 = vperm.xlu0 %1777, %v1497_v32   ;;  %v1827_v46 = vld [vmem:[%s2541_s2 + $0x44] ss:$8 sps:$4 sm:$0xff]  }
 0x10d   :  { %v2146_v50 = vpop.f32.mrf.mxu0 }
 0x10e   :  { %883 = vmatpush1.bf16.msra.mxu0 %v343_v49  ;;  %1765 = vmatpush1.bf16.msra.mxu1 %v343_v49  ;;  %v290_v14 = vmax.f32 %v2146_v50, 0.0  ;;  %v1831_v49 = vld [vmem:[%s2541_s2 + $0x40] ss:$8 sps:$4 sm:$0xff]   ;;  %v1811_v50 = vld [vmem:[%s2541_s2 + $0xa4] ss:$8 sps:$4 sm:$0xff]  }
 0x10f   :  { %v1726_v56 = vpop.f32.mrf.mxu0  ;;  %884 = vmatprep.subr.bf16.mxu0 %v1879_v13  ;;  %1755 = vmatprep.subr.bf16.mxu1 %v1879_v13 }
 0x110   :  { %v1823_v56 = vld [vmem:[%s2541_s2 + $0xc4] ss:$8 sps:$4 sm:$0xff]  }
 0x111   :  { %v2158_v59 = vpop.f32.mrf.mxu0 }
 0x112   :  { %885 = vmatpush1.bf16.msra.mxu0 %v342_v58  ;;  %1766 = vmatpush1.bf16.msra.mxu1 %v342_v58  ;;  %v291_v15 = vmax.f32 %v2158_v59, 0.0  ;;  %v1829_v58 = vld [vmem:[%s2541_s2 + $0xd4] ss:$8 sps:$4 sm:$0xff]   ;;  %v1832_v59 = vld [vmem:[%s2541_s2 + $0xd0] ss:$8 sps:$4 sm:$0xff]  }
 0x113   :  { %v1727_v63 = vpop.f32.mrf.mxu0  ;;  %886 = vmatprep.subr.bf16.mxu0 %v1879_v13  ;;  %1756 = vmatprep.subr.bf16.mxu1 %v1879_v13 }
 0x114   :  { %v347_v20 = vpack.c.bf16 %v291_v15, %v290_v14  ;;  %v1838_v63 = vld [vmem:[%s2541_s2 + $0xf0] ss:$8 sps:$4 sm:$0xff]  }
 0x115   :  { %v265_v51 = vpop.f32.mrf.mxu0  ;;  %v1856_v15 = vld [vmem:[%s2541_s2 + $0x150] ss:$8 sps:$4 sm:$0xff]  }
 0x116   :  { %887 = vmatpush1.bf16.msra.mxu0 %v341_v0  ;;  %1767 = vmatpush1.bf16.msra.mxu1 %v341_v0  ;;  %v292_v10 = vmax.f32 %v265_v51, 0.0  ;;  %v1841_v0 = vld [vmem:[%s2541_s2 + $0x100] ss:$8 sps:$4 sm:$0xff]   ;;  %v1842_v51 = vld [vmem:[%s2541_s2 + $0x114] ss:$8 sps:$4 sm:$0xff]  }
 0x117   :  { %v1730_v4 = vpop.f32.mrf.mxu0  ;;  %888 = vmatprep.subr.bf16.mxu0 %v1879_v13  ;;  %1757 = vmatprep.subr.bf16.mxu1 %v1879_v13 }
 0x118   :  { %v1848_v4 = vld [vmem:[%s2541_s2 + $0x134] ss:$8 sps:$4 sm:$0xff]  }
 0x119   :  { %v268_v5 = vpop.f32.mrf.mxu0 }
 0x11a   :  { %889 = vmatpush1.bf16.msra.mxu0 %v340_v47  ;;  %1768 = vmatpush1.bf16.msra.mxu1 %v340_v47  ;;  %v293_v11 = vmax.f32 %v268_v5, 0.0  ;;  %v2367_v47 = vpop.permute.xlu0 %545  ;;  %v2370_v5 = vpop.permute.xlu1 %465 }
 0x11b   :  { %v1731_v7 = vpop.f32.mrf.mxu0  ;;  %890 = vmatprep.subr.bf16.mxu0 %v1879_v13  ;;  %1758 = vmatprep.subr.bf16.mxu1 %v1879_v13 }
 0x11c   :  { %v348_v16 = vpack.c.bf16 %v293_v11, %v292_v10  ;;  %v1851_v7 = vld [vmem:[%s2541_s2 + $0x144] ss:$8 sps:$4 sm:$0xff]   ;;  %v1853_v10 = vld [vmem:[%s2541_s2 + $0x140] ss:$8 sps:$4 sm:$0xff]   ;;  %v1854_v11 = vld [vmem:[%s2541_s2 + $0x154] ss:$8 sps:$4 sm:$0xff]  }
 0x11e   :  { %891 = vmatpush1.bf16.msra.mxu0 %v2036_v42  ;;  %1769 = vmatpush1.bf16.msra.mxu1 %v2036_v42  ;;  %v1174_v42 = vld [vmem:[%s2543_s5 + $0x28] sm:$0xff]  ;;  %v2372_v43 = vpop.permute.xlu0 %550  ;;  %v2380_v8 = vpop.permute.xlu1 %470 }
 0x11f   :  { %892 = vmatprep.subr.bf16.mxu0 %v1879_v13  ;;  %1759 = vmatprep.subr.bf16.mxu1 %v1879_v13 }
 0x120   :  { %1204 = vperm.xlu1 %1778, %v1174_v42  }
 0x122   :  { %893 = vmatpush1.bf16.msra.mxu0 %v2022_v31  ;;  %1770 = vmatpush1.bf16.msra.mxu1 %v2022_v31  ;;  %v1175_v31 = vld [vmem:[%s2543_s5 + $0x30] sm:$0xff]  ;;  %v2383_v9 = vpop.permute.xlu0 %535  ;;  %v2391_v42 = vpop.permute.xlu1 %540 }
 0x123   :  { %904 = vmatprep.subr.bf16.mxu0 %v1879_v13  ;;  %1760 = vmatprep.subr.bf16.mxu1 %v1879_v13 }
 0x124   :  { %1209 = vperm.xlu1 %1778, %v1175_v31  }
 0x126   :  { %905 = vmatpush2.bf16.msra.mxu0 %v348_v16  ;;  %1771 = vmatpush2.bf16.msra.mxu1 %v348_v16  ;;  %v456_v12 = vpop.permute.xlu0 %455  ;;  %v461_v14 = vpop.permute.xlu1 %460 }
 0x127   :  { %906 = vmatprep.subr.bf16.mxu0 %v1879_v13  ;;  %1761 = vmatprep.subr.bf16.mxu1 %v1879_v13 }
 0x128   :  { %1214 = vperm.xlu1 %1778, %v1176_v21  }
 0x12a   :  { %907 = vmatpush2.bf16.msra.mxu0 %v347_v20  ;;  %1772 = vmatpush2.bf16.msra.mxu1 %v347_v20  ;;  %v2397_v16 = vpop.permute.xlu0 %525  ;;  %v2399_v31 = vpop.permute.xlu1 %530 }
 0x12b   :  { %908 = vmatprep.subr.bf16.mxu0 %v1879_v13  ;;  %1762 = vmatprep.subr.bf16.mxu1 %v1879_v13  ;;  %v1809_v13 = vld [vmem:[%s2541_s2 + $0x14] ss:$8 sps:$4 sm:$0xff]  }
 0x12c   :  { %1463 = vperm.xlu1 %1778, %v1433_v28  }
 0x12e   :  { %909 = vmatpush2.bf16.msra.mxu0 %v346_v24  ;;  %1773 = vmatpush2.bf16.msra.mxu1 %v346_v24  ;;  %v446_v17 = vpop.permute.xlu0 %445  ;;  %v451_v18 = vpop.permute.xlu1 %450 }
 0x130   :  { %1473 = vperm.xlu1 %1778, %v1435_v30  }
 0x131   :  { %951 = vmatmul.mubr.bf16.vlgmr.msra.gmra.mxu1 %v1791_v25  ;;  %911 = vmatmul.mubr.bf16.vlgmr.msra.gmra.mxu0 %v1803_v27 }
 0x132   :  { %1592 = vmatprep.mubr.msk.bf16.mxu1 %vm811_vm2, %v1794_v26  ;;  %1587 = vmatprep.mubr.msk.bf16.mxu0 %vm811_vm2, %v1809_v13  ;;  %v2401_v19 = vpop.permute.xlu0 %515  ;;  %v2403_v20 = vpop.permute.xlu1 %520 }
 0x136   :  { %v2405_v21 = vpop.permute.xlu0 %435  ;;  %v2407_v22 = vpop.permute.xlu1 %440 }
 0x139   :  { %959 = vmatmul.mubr.bf16.gmra.mxu1 %v1796_v33  ;;  %919 = vmatmul.mubr.bf16.gmra.mxu0 %v1813_v34 }
 0x13a   :  { %1593 = vmatprep.mubr.msk.bf16.mxu1 %vm811_vm2, %v1797_v35  ;;  %1588 = vmatprep.mubr.msk.bf16.mxu0 %vm811_vm2, %v1815_v36  ;;  %v2409_v23 = vpop.permute.xlu0 %505  ;;  %v2411_v24 = vpop.permute.xlu1 %510  ;;  %v1859_v35 = vld [vmem:[%s2546_s4 + $0x4] ss:$12 sps:$4 sm:$0xff]  }
 0x13e   :  { %v2413_v25 = vpop.permute.xlu0 %425  ;;  %v2415_v26 = vpop.permute.xlu1 %430 }
 0x141   :  { %967 = vmatmul.mubr.bf16.gmra.mxu1 %v1799_v37  ;;  %927 = vmatmul.mubr.bf16.gmra.mxu0 %v1819_v38 }
 0x142   :  { %1594 = vmatprep.mubr.msk.bf16.mxu1 %vm811_vm2, %v1800_v39  ;;  %1589 = vmatprep.mubr.msk.bf16.mxu0 %vm811_vm2, %v1821_v40  ;;  %v2417_v27 = vpop.permute.xlu0 %495  ;;  %v2419_v13 = vpop.permute.xlu1 %500 }
 0x146   :  { %v416_v28 = vpop.permute.xlu0 %415  ;;  %v421_v29 = vpop.permute.xlu1 %420 }
 0x149   :  { %975 = vmatmul.mubr.bf16.gmra.mxu1 %v1802_v41  ;;  %935 = vmatmul.mubr.bf16.gmra.mxu0 %v1825_v44 }
 0x14a   :  { %1595 = vmatprep.mubr.msk.bf16.mxu1 %vm811_vm2, %v1806_v45  ;;  %1590 = vmatprep.mubr.msk.bf16.mxu0 %vm811_vm2, %v1827_v46  ;;  %v2421_v30 = vpop.permute.xlu0 %485  ;;  %v2423_v32 = vpop.permute.xlu1 %490 }
 0x14e   :  { %v406_v33 = vpop.permute.xlu0 %405  ;;  %v411_v34 = vpop.permute.xlu1 %410 }
 0x151   :  { %983 = vmatmul.mubr.bf16.gmra.mxu1 %v1808_v48  ;;  %943 = vmatmul.mubr.bf16.gmra.mxu0 %v1831_v49 }
 0x152   :  { %1596 = vmatprep.mubr.msk.bf16.mxu1 %vm811_vm2, %v1811_v50  ;;  %v2428_v36 = vpop.permute.xlu0 %475  ;;  %1322 = vmatprep.mubr.bf16.mxu0 %v1859_v35  ;;  %v2430_v37 = vpop.permute.xlu1 %480 }
 0x156   :  { %v396_v38 = vpop.permute.xlu0 %395  ;;  %v401_v48 = vpop.permute.xlu1 %400 }
 0x159   :  { %991 = vmatmul.mubr.bf16.gmra.mxu1 %v1814_v52 }
 0x15a   :  { %1597 = vmatprep.mubr.msk.bf16.mxu1 %vm811_vm2, %v1817_v53 }
 0x161   :  { %999 = vmatmul.mubr.bf16.gmra.mxu1 %v1820_v54 }
 0x162   :  { %1598 = vmatprep.mubr.msk.bf16.mxu1 %vm811_vm2, %v1823_v56 }
 0x169   :  { %1007 = vmatmul.mubr.bf16.gmra.mxu1 %v1826_v57 }
 0x16a   :  { %1599 = vmatprep.mubr.msk.bf16.mxu1 %vm811_vm2, %v1829_v58 }
 0x171   :  { %1015 = vmatmul.mubr.bf16.gmra.mxu1 %v1832_v59 }
 0x172   :  { %1600 = vmatprep.mubr.msk.bf16.mxu1 %vm811_vm2, %v1833_v60 }
 0x179   :  { %1023 = vmatmul.mubr.bf16.gmra.mxu1 %v1835_v61 }
 0x17a   :  { %1601 = vmatprep.mubr.msk.bf16.mxu1 %vm811_vm2, %v1836_v62 }
 0x181   :  { %1031 = vmatmul.mubr.bf16.gmra.mxu1 %v1838_v63 }
 0x182   :  { %1602 = vmatprep.mubr.msk.bf16.mxu1 %vm811_vm2, %v1839_v55 }
 0x189   :  { %1039 = vmatmul.mubr.bf16.gmra.mxu1 %v1841_v0 }
 0x18a   :  { %1603 = vmatprep.mubr.msk.bf16.mxu1 %vm811_vm2, %v1842_v51 }
 0x191   :  { %1047 = vmatmul.mubr.bf16.gmra.mxu1 %v1844_v1 }
 0x192   :  { %1604 = vmatprep.mubr.msk.bf16.mxu1 %vm811_vm2, %v1845_v2 }
 0x199   :  { %1055 = vmatmul.mubr.bf16.gmra.mxu1 %v1847_v3 }
 0x19a   :  { %1605 = vmatprep.mubr.msk.bf16.mxu1 %vm811_vm2, %v1848_v4 }
 0x1a1   :  { %1063 = vmatmul.mubr.bf16.gmra.mxu1 %v1850_v6 }
 0x1a2   :  { %1606 = vmatprep.mubr.msk.bf16.mxu1 %vm811_vm2, %v1851_v7 }
 0x1a9   :  { %1071 = vmatmul.mubr.bf16.gmra.mxu1 %v1853_v10 }
 0x1aa   :  { %1607 = vmatprep.mubr.msk.bf16.mxu1 %vm811_vm2, %v1854_v11 }
 0x1b1   :  { %1079 = vmatmul.mubr.bf16.gmra.mxu1 %v1856_v15 }
 0x1f1   :  { %v952_v39 = vpop.f32.mrf.mxu1  ;;  %v912_v40 = vpop.f32.mrf.mxu0 }
 0x1f2   :  { %v913_v41 = vadd.f32 %v912_v40, %v396_v38  ;;  %v953_v46 = vadd.f32 %v952_v39, %v446_v17 }
 0x1f3   :  { %v954_v44 = vpop.f32.mrf.mxu1  ;;  %v914_v45 = vpop.f32.mrf.mxu0 }
 0x1f4   :  { %v1087_v53 = vmax.f32 %v913_v41, 0.0  ;;  %v1097_v58 = vmax.f32 %v953_v46, 0.0 }
 0x1f5   :  { %v955_v49 = vpop.f32.mrf.mxu1  ;;  %v915_v50 = vpop.f32.mrf.mxu0 }
 0x1f6   :  { %v956_v52 = vadd.f32 %v955_v49, %v451_v18  ;;  %v916_v54 = vadd.f32 %v915_v50, %v401_v48 }
 0x1f7   :  { %v957_v56 = vpop.f32.mrf.mxu1  ;;  %v917_v57 = vpop.f32.mrf.mxu0 }
 0x1f8   :  { %v1098_v59 = vmax.f32 %v956_v52, 0.0  ;;  %v1088_v60 = vmax.f32 %v916_v54, 0.0 }
 0x1f9   :  { %v960_v61 = vpop.f32.mrf.mxu1  ;;  %v920_v62 = vpop.f32.mrf.mxu0 }
 0x1fa   :  { %v2432_v63 = vpack.c.bf16 %v1098_v59, %v1097_v58  ;;  %v2434_v55 = vpack.c.bf16 %v1088_v60, %v1087_v53  ;;  %v921_v0 = vadd.f32 %v920_v62, %v406_v33  ;;  %v961_v2 = vadd.f32 %v960_v61, %v456_v12 }
 0x1fb   :  { %v962_v51 = vpop.f32.mrf.mxu1  ;;  %v922_v1 = vpop.f32.mrf.mxu0 }
 0x1fc   :  { %v1089_v7 = vmax.f32 %v921_v0, 0.0  ;;  %v1099_v17 = vmax.f32 %v961_v2, 0.0 }
 0x1fd   :  { %v963_v3 = vpop.f32.mrf.mxu1  ;;  %v923_v4 = vpop.f32.mrf.mxu0 }
 0x1fe   :  { %v964_v6 = vadd.f32 %v963_v3, %v461_v14  ;;  %v924_v10 = vadd.f32 %v923_v4, %v411_v34 }
 0x1ff   :  { %v965_v11 = vpop.f32.mrf.mxu1  ;;  %v925_v15 = vpop.f32.mrf.mxu0 }
 0x200   :  { %v1100_v18 = vmax.f32 %v964_v6, 0.0  ;;  %v1090_v35 = vmax.f32 %v924_v10, 0.0 }
 0x201   :  { %v968_v38 = vpop.f32.mrf.mxu1  ;;  %v928_v39 = vpop.f32.mrf.mxu0 }
 0x202   :  { %v2436_v40 = vpack.c.bf16 %v1100_v18, %v1099_v17  ;;  %v2438_v41 = vpack.c.bf16 %v1090_v35, %v1089_v7  ;;  %v929_v33 = vadd.f32 %v928_v39, %v416_v28  ;;  %v969_v12 = vadd.f32 %v968_v38, %v2370_v5 }
 0x203   :  { %v970_v44 = vpop.f32.mrf.mxu1  ;;  %v930_v45 = vpop.f32.mrf.mxu0 }
 0x204   :  { %v1091_v48 = vmax.f32 %v929_v33, 0.0  ;;  %v1101_v53 = vmax.f32 %v969_v12, 0.0 }
 0x205   :  { %v971_v46 = vpop.f32.mrf.mxu1  ;;  %v931_v14 = vpop.f32.mrf.mxu0 }
 0x206   :  { %v972_v34 = vadd.f32 %v971_v46, %v2380_v8  ;;  %v932_v49 = vadd.f32 %v931_v14, %v421_v29 }
 0x207   :  { %v973_v50 = vpop.f32.mrf.mxu1  ;;  %v933_v52 = vpop.f32.mrf.mxu0 }
 0x208   :  { %v1102_v54 = vmax.f32 %v972_v34, 0.0  ;;  %v1092_v56 = vmax.f32 %v932_v49, 0.0 }
 0x209   :  { %v976_v57 = vpop.f32.mrf.mxu1  ;;  %v936_v58 = vpop.f32.mrf.mxu0 }
 0x20a   :  { %v2442_v59 = vpack.c.bf16 %v1102_v54, %v1101_v53  ;;  %v2444_v28 = vpack.c.bf16 %v1092_v56, %v1091_v48  ;;  %v937_v60 = vadd.f32 %v936_v58, %v2413_v25  ;;  %v977_v62 = vadd.f32 %v976_v57, %v2428_v36 }
 0x20b   :  { %v978_v5 = vpop.f32.mrf.mxu1  ;;  %v938_v61 = vpop.f32.mrf.mxu0 }
 0x20c   :  { %v1093_v51 = vmax.f32 %v937_v60, 0.0  ;;  %v1103_v4 = vmax.f32 %v977_v62, 0.0 }
 0x20d   :  { %v979_v8 = vpop.f32.mrf.mxu1  ;;  %v939_v0 = vpop.f32.mrf.mxu0 }
 0x20e   :  { %v980_v29 = vadd.f32 %v979_v8, %v2430_v37  ;;  %v940_v1 = vadd.f32 %v939_v0, %v2415_v26 }
 0x20f   :  { %v981_v2 = vpop.f32.mrf.mxu1  ;;  %v941_v3 = vpop.f32.mrf.mxu0 }
 0x210   :  { %v1104_v6 = vmax.f32 %v980_v29, 0.0  ;;  %v1094_v7 = vmax.f32 %v940_v1, 0.0 }
 0x211   :  { %v984_v10 = vpop.f32.mrf.mxu1  ;;  %v944_v11 = vpop.f32.mrf.mxu0 }
 0x212   :  { %v2450_v15 = vpack.c.bf16 %v1104_v6, %v1103_v4  ;;  %v2452_v25 = vpack.c.bf16 %v1094_v7, %v1093_v51  ;;  %v985_v18 = vadd.f32 %v984_v10, %v2421_v30 }
 0x213   :  { %v986_v17 = vpop.f32.mrf.mxu1  ;;  %v946_v36 = vpop.f32.mrf.mxu0 }
 0x214   :  { %v1105_v33 = vmax.f32 %v985_v18, 0.0 }
 0x215   :  { %v987_v35 = vpop.f32.mrf.mxu1  ;;  %v947_v37 = vpop.f32.mrf.mxu0 }
 0x216   :  { %v988_v38 = vadd.f32 %v987_v35, %v2423_v32 }
 0x217   :  { %v989_v26 = vpop.f32.mrf.mxu1  ;;  %v949_v39 = vpop.f32.mrf.mxu0 }
 0x218   :  { %v1106_v44 = vmax.f32 %v988_v38, 0.0 }
 0x219   :  { %v2456_v45 = vpop.f32.mrf.mxu1 }
 0x21a   :  { %v2458_v12 = vpack.c.bf16 %v1106_v44, %v1105_v33  ;;  %v945_v44 = vadd.f32 %v944_v11, %v2405_v21 }
 0x21b   :  { %v994_v46 = vpop.f32.mrf.mxu1 }
 0x21d   :  { %v995_v14 = vpop.f32.mrf.mxu1 }
 0x21e   :  { %v996_v21 = vadd.f32 %v995_v14, %v2419_v13 }
 0x21f   :  { %v997_v34 = vpop.f32.mrf.mxu1 }
 0x221   :  { %v1000_v48 = vpop.f32.mrf.mxu1 }
 0x223   :  { %v1002_v49 = vpop.f32.mrf.mxu1 }
 0x225   :  { %v1003_v50 = vpop.f32.mrf.mxu1 }
 0x226   :  { %v1004_v34 = vadd.f32 %v1003_v50, %v2411_v24  ;;  %v993_v24 = vadd.f32 %v2456_v45, %v2417_v27  ;;  %v611_v45 = vpop.permute.xlu1 %610 }
 0x227   :  { %v1005_v52 = vpop.f32.mrf.mxu1 }
 0x228   :  { %v1110_v11 = vmax.f32 %v1004_v34, 0.0 }
 0x229   :  { %v1008_v30 = vpop.f32.mrf.mxu1 }
 0x22b   :  { %v1010_v53 = vpop.f32.mrf.mxu1 }
 0x22c   :  { %v1001_v53 = vadd.f32 %v1000_v48, %v2409_v23  ;;  %v1108_v48 = vmax.f32 %v996_v21, 0.0 }
 0x22d   :  { %v1011_v54 = vpop.f32.mrf.mxu1 }
 0x22e   :  { %v1109_v50 = vmax.f32 %v1001_v53, 0.0 }
 0x22f   :  { %v1013_v56 = vpop.f32.mrf.mxu1 }
 0x230   :  { %v1158_v56 = vpack.c.bf16 %v1110_v11, %v1109_v50 }
 0x231   :  { %v1016_v32 = vpop.f32.mrf.mxu1 }
 0x232   :  { %v1017_v35 = vadd.f32 %v1016_v32, %v2397_v16  ;;  %v948_v16 = vadd.f32 %v947_v37, %v2407_v22 }
 0x233   :  { %v1018_v57 = vpop.f32.mrf.mxu1 }
 0x234   :  { %v1107_v57 = vmax.f32 %v993_v24, 0.0  ;;  %v1869_v24 = vld [vmem:[%s2546_s4 + $0x8] ss:$12 sps:$4 sm:$0xff]  }
 0x235   :  { %v1019_v58 = vpop.f32.mrf.mxu1 }
 0x236   :  { %v1020_v7 = vadd.f32 %v1019_v58, %v2399_v31  ;;  %v1113_v31 = vmax.f32 %v1017_v35, 0.0  ;;  %v1157_v14 = vpack.c.bf16 %v1108_v48, %v1107_v57 }
 0x237   :  { %v1021_v60 = vpop.f32.mrf.mxu1 }
 0x238   :  { %v1114_v39 = vmax.f32 %v1020_v7, 0.0 }
 0x239   :  { %v1024_v5 = vpop.f32.mrf.mxu1 }
 0x23a   :  { %v1025_v3 = vadd.f32 %v1024_v5, %v2383_v9 }
 0x23b   :  { %v1026_v61 = vpop.f32.mrf.mxu1 }
 0x23c   :  { %v1115_v38 = vmax.f32 %v1025_v3, 0.0  ;;  %v606_v61 = vpop.permute.xlu0 %605 }
 0x23d   :  { %v1027_v62 = vpop.f32.mrf.mxu1 }
 0x23e   :  { %v1028_v51 = vadd.f32 %v1027_v62, %v2391_v42 }
 0x23f   :  { %v1029_v8 = vpop.f32.mrf.mxu1 }
 0x240   :  { %v1116_v10 = vmax.f32 %v1028_v51, 0.0  ;;  %v1862_v51 = vld [vmem:[%s2546_s4 + $0x18] ss:$12 sps:$4 sm:$0xff]  }
 0x241   :  { %v1032_v0 = vpop.f32.mrf.mxu1 }
 0x242   :  { %v1033_v1 = vadd.f32 %v1032_v0, %v2367_v47  ;;  %v1012_v47 = vadd.f32 %v1011_v54, %v2403_v20  ;;  %v1161_v33 = vpack.c.bf16 %v1116_v10, %v1115_v38  ;;  %v1160_v20 = vpack.c.bf16 %v1114_v39, %v1113_v31  ;;  %v1866_v31 = vld [vmem:[%s2546_s4 + $0x4c] ss:$12 sps:$4 sm:$0xff]  }
 0x243   :  { %v1034_v29 = vpop.f32.mrf.mxu1 }
 0x244   :  { %v1117_v17 = vmax.f32 %v1033_v1, 0.0  ;;  %v1112_v49 = vmax.f32 %v1012_v47, 0.0  ;;  %v596_v29 = vpop.permute.xlu0 %595 }
 0x245   :  { %v1035_v2 = vpop.f32.mrf.mxu1 }
 0x246   :  { %v1036_v4 = vadd.f32 %v1035_v2, %v2372_v43  ;;  %v1009_v43 = vadd.f32 %v1008_v30, %v2401_v19  ;;  %v1095_v19 = vmax.f32 %v945_v44, 0.0  ;;  %v1096_v30 = vmax.f32 %v948_v16, 0.0 }
 0x247   :  { %v1037_v6 = vpop.f32.mrf.mxu1 }
 0x248   :  { %v1118_v36 = vmax.f32 %v1036_v4, 0.0  ;;  %v586_v3 = vpop.permute.xlu0 %585 }
 0x249   :  { %v2465_v18 = vpop.f32.mrf.mxu1 }
 0x24a   :  { %v1162_v26 = vpack.c.bf16 %v1118_v36, %v1117_v17 }
 0x24b   :  { %v1042_v42 = vpop.f32.mrf.mxu1 }
 0x24c   :  { %1636 = vmatprep.subr.bf16.mxu0 %v1162_v26 }
 0x24d   :  { %v2469_v9 = vpop.f32.mrf.mxu1  ;;  %1637 = vmatpush3.bf16.msra.mxu0 %v2442_v59  ;;  %v1111_v59 = vmax.f32 %v1009_v43, 0.0  ;;  %v576_v43 = vpop.permute.xlu0 %575 }
 0x24e   :  { %1638 = vmatprep.subr.bf16.mxu0 %v1161_v33  ;;  %v1865_v33 = vld [vmem:[%s2546_s4 + $0x30] ss:$12 sps:$4 sm:$0xff]  }
 0x24f   :  { %v1045_v46 = vpop.f32.mrf.mxu1  ;;  %v1159_v22 = vpack.c.bf16 %v1112_v49, %v1111_v59 }
 0x251   :  { %v2476_v52 = vpop.f32.mrf.mxu1  ;;  %1639 = vmatpush3.bf16.msra.mxu0 %v2436_v40  ;;  %v1151_v40 = vpack.c.bf16 %v1096_v30, %v1095_v19  ;;  %v566_v30 = vpop.permute.xlu0 %565 }
 0x252   :  { %1640 = vmatprep.subr.bf16.mxu0 %v1160_v20  ;;  %v1049_v50 = vadd.f32 %v2476_v52, %v566_v30 }
 0x253   :  { %v1050_v54 = vpop.f32.mrf.mxu1 }
 0x255   :  { %v2481_v37 = vpop.f32.mrf.mxu1  ;;  %1641 = vmatpush3.bf16.msra.mxu0 %v2432_v63 }
 0x256   :  { %1642 = vmatprep.subr.bf16.mxu0 %v1159_v22  ;;  %v1868_v22 = vld [vmem:[%s2546_s4 + $0x48] ss:$12 sps:$4 sm:$0xff]  }
 0x257   :  { %v1053_v23 = vpop.f32.mrf.mxu1 }
 0x259   :  { %v2486_v32 = vpop.f32.mrf.mxu1  ;;  %1643 = vmatpush3.bf16.msra.mxu0 %v1151_v40 }
 0x25a   :  { %1644 = vmatprep.subr.bf16.mxu0 %v1158_v56  ;;  %v1057_v59 = vadd.f32 %v2486_v32, %v576_v43  ;;  %v556_v32 = vpop.permute.xlu0 %555 }
 0x25b   :  { %v1058_v13 = vpop.f32.mrf.mxu1  ;;  %v1041_v57 = vadd.f32 %v2465_v18, %v556_v32  ;;  %v1872_v18 = vld [vmem:[%s2546_s4 + $0x50] ss:$12 sps:$4 sm:$0xff]  }
 0x25c   :  { %v1123_v40 = vmax.f32 %v1057_v59, 0.0  ;;  %v1121_v13 = vmax.f32 %v1049_v50, 0.0 }
 0x25d   :  { %v1059_v58 = vpop.f32.mrf.mxu1  ;;  %1645 = vmatpush3.bf16.msra.mxu0 %v2452_v25  ;;  %v1857_v25 = vld [vmem:[%s2546_s4] ss:$12 sps:$4 sm:$0xff]   ;;  %v1119_v52 = vmax.f32 %v1041_v57, 0.0 }
 0x25e   :  { %1646 = vmatprep.subr.bf16.mxu0 %v1157_v14 }
 0x25f   :  { %v1061_v63 = vpop.f32.mrf.mxu1 }
 0x261   :  { %v1064_v60 = vpop.f32.mrf.mxu1  ;;  %1647 = vmatpush3.bf16.msra.mxu0 %v2444_v28  ;;  %v1860_v28 = vld [vmem:[%s2546_s4 + $0x1c] ss:$12 sps:$4 sm:$0xff]  }
 0x262   :  { %1648 = vmatprep.subr.bf16.mxu0 %v2458_v12  ;;  %v601_v12 = vpop.permute.xlu1 %600  ;;  %v1065_v44 = vadd.f32 %v1064_v60, %v586_v3  ;;  %v1871_v60 = vld [vmem:[%s2546_s4 + $0x38] ss:$12 sps:$4 sm:$0xff]  }
 0x263   :  { %v1066_v27 = vpop.f32.mrf.mxu1 }
 0x264   :  { %v1125_v19 = vmax.f32 %v1065_v44, 0.0 }
 0x265   :  { %v1067_v5 = vpop.f32.mrf.mxu1  ;;  %1649 = vmatpush3.bf16.msra.mxu0 %v2438_v41 }
 0x266   :  { %1650 = vmatprep.subr.bf16.mxu0 %v2450_v15  ;;  %v591_v1 = vpop.permute.xlu1 %590 }
 0x267   :  { %v1069_v62 = vpop.f32.mrf.mxu1  ;;  %v1068_v26 = vadd.f32 %v1067_v5, %v591_v1 }
 0x269   :  { %v1072_v8 = vpop.f32.mrf.mxu1  ;;  %1651 = vmatpush3.bf16.msra.mxu0 %v2434_v55  ;;  %v1863_v55 = vld [vmem:[%s2546_s4 + $0x34] ss:$12 sps:$4 sm:$0xff]   ;;  %v1126_v49 = vmax.f32 %v1068_v26, 0.0 }
 0x26a   :  { %v1073_v17 = vadd.f32 %v1072_v8, %v596_v29  ;;  %v581_v35 = vpop.permute.xlu1 %580 }
 0x26b   :  { %v1074_v0 = vpop.f32.mrf.mxu1  ;;  %v1060_v34 = vadd.f32 %v1059_v58, %v581_v35  ;;  %v1166_v11 = vpack.c.bf16 %v1126_v49, %v1125_v19 }
 0x26c   :  { %1323 = vmatmul.mubr.bf16.vlgmr.msra.gmra.mxu0 %v1857_v25  ;;  %v1127_v16 = vmax.f32 %v1073_v17, 0.0  ;;  %v1180_v0 = vpop.permute.xlu0 %1179 }
 0x26d   :  { %v1075_v41 = vpop.f32.mrf.mxu1  ;;  %1330 = vmatprep.mubr.bf16.mxu0 %v1860_v28  ;;  %v1124_v21 = vmax.f32 %v1060_v34, 0.0 }
 0x26e   :  { %v1076_v6 = vadd.f32 %v1075_v41, %v601_v12  ;;  %v571_v53 = vpop.permute.xlu1 %570 }
 0x26f   :  { %v1077_v15 = vpop.f32.mrf.mxu1  ;;  %v1052_v54 = vadd.f32 %v2481_v37, %v571_v53  ;;  %v1165_v56 = vpack.c.bf16 %v1124_v21, %v1123_v40 }
 0x270   :  { %v1128_v42 = vmax.f32 %v1076_v6, 0.0  ;;  %v1190_v1 = vpop.permute.xlu0 %1189 }
 0x271   :  { %v1080_v2 = vpop.f32.mrf.mxu1  ;;  %v1122_v37 = vmax.f32 %v1052_v54, 0.0 }
 0x272   :  { %v1081_v7 = vadd.f32 %v1080_v2, %v606_v61  ;;  %v1167_v20 = vpack.c.bf16 %v1128_v42, %v1127_v16  ;;  %v561_v23 = vpop.permute.xlu1 %560 }
 0x273   :  { %v1082_v4 = vpop.f32.mrf.mxu1  ;;  %v1044_v48 = vadd.f32 %v2469_v9, %v561_v23  ;;  %v1164_v58 = vpack.c.bf16 %v1122_v37, %v1121_v13  ;;  %v1870_v9 = vld [vmem:[%s2546_s4 + $0x20] ss:$12 sps:$4 sm:$0xff]  }
 0x274   :  { %1331 = vmatmul.mubr.bf16.gmra.mxu0 %v1862_v51  ;;  %v1129_v47 = vmax.f32 %v1081_v7, 0.0  ;;  %v1200_v3 = vpop.permute.xlu0 %1199 }
 0x275   :  { %v1083_v10 = vpop.f32.mrf.mxu1  ;;  %1338 = vmatprep.mubr.bf16.mxu0 %v1863_v55  ;;  %v1120_v14 = vmax.f32 %v1044_v48, 0.0 }
 0x276   :  { %v1084_v36 = vadd.f32 %v1083_v10, %v611_v45  ;;  %v1185_v41 = vpop.permute.xlu1 %1184 }
 0x277   :  { %v1085_v38 = vpop.f32.mrf.mxu1  ;;  %v1163_v63 = vpack.c.bf16 %v1120_v14, %v1119_v52 }
 0x278   :  { %v1130_v39 = vmax.f32 %v1084_v36, 0.0  ;;  %v1444_v10 = vpop.permute.xlu0 %1443 }
 0x27a   :  { %v1168_v46 = vpack.c.bf16 %v1130_v39, %v1129_v47  ;;  %v1195_v2 = vpop.permute.xlu1 %1194 }
 0x27c   :  { %1339 = vmatmul.mubr.bf16.gmra.mxu0 %v1865_v33  ;;  %1732 = vmatprep.subr.bf16.mxu0 %v1168_v46  ;;  %v1449_v33 = vpop.permute.xlu0 %1448 }
 0x27d   :  { %1733 = vmatpush3.bf16.msra.mxu0 %v1168_v46  ;;  %1346 = vmatprep.mubr.bf16.mxu0 %v1866_v31 }
 0x27e   :  { %1734 = vmatprep.subr.bf16.mxu0 %v1167_v20  ;;  %v1439_v6 = vpop.permute.xlu1 %1438 }
 0x281   :  { %1735 = vmatpush3.bf16.msra.mxu0 %v1167_v20 }
 0x282   :  { %1736 = vmatprep.subr.bf16.mxu0 %v1166_v11  ;;  %v1205_v36 = vpop.permute.xlu1 %1204 }
 0x284   :  { %1347 = vmatmul.mubr.bf16.gmra.mxu0 %v1868_v22 }
 0x285   :  { %1737 = vmatpush3.bf16.msra.mxu0 %v1166_v11  ;;  %1744 = vmatprep.mubr.msk.bf16.mxu0 %vm1277_vm3, %v1869_v24  ;;  %v1454_v11 = vpop.permute.xlu0 %1453 }
 0x286   :  { %1738 = vmatprep.subr.bf16.mxu0 %v1165_v56  ;;  %v1210_v16 = vpop.permute.xlu1 %1209 }
 0x289   :  { %1739 = vmatpush3.bf16.msra.mxu0 %v1165_v56 }
 0x28a   :  { %1740 = vmatprep.subr.bf16.mxu0 %v1164_v58  ;;  %v1215_v37 = vpop.permute.xlu1 %1214 }
 0x28d   :  { %1741 = vmatpush3.bf16.msra.mxu0 %v1164_v58 }
 0x28e   :  { %1742 = vmatprep.subr.bf16.mxu0 %v1163_v63 }
 0x291   :  { %1743 = vmatpush3.bf16.msra.mxu0 %v1163_v63 }
 0x294   :  { %1745 = vmatmul.mubr.msk.bf16.vlgmr.msra.gmra.mxu0 %vm1277_vm3, %v1870_v9 }
 0x295   :  { %1748 = vmatprep.mubr.msk.bf16.mxu0 %vm1277_vm3, %v1871_v60 }
 0x29c   :  { %1749 = vmatmul.mubr.msk.bf16.gmra.mxu0 %vm1277_vm3, %v1872_v18 }
 0x32c   :  { %v1652_v27 = vpop.f32.mrf.mxu0 }
 0x32e   :  { %v1653_v45 = vpop.f32.mrf.mxu0 }
 0x32f   :  { %v1654_v17 = vadd.f32 %v1653_v45, %v1652_v27 }
 0x330   :  { %v1655_v5 = vpop.f32.mrf.mxu0 }
 0x331   :  { %v1325_v39 = vadd.f32 %v1654_v17, %v1180_v0  ;;  %v1503_v17 = vlaneseq }
 0x332   :  { %v1656_v61 = vpop.f32.mrf.mxu0 }
 0x333   :  { %v1657_v42 = vadd.f32 %v1656_v61, %v1655_v5  ;;  %v1459_v5 = vpop.permute.xlu0 %1458 }
 0x334   :  { %v1658_v62 = vpop.f32.mrf.mxu0 }
 0x335   :  { %v1328_v53 = vadd.f32 %v1657_v42, %v1185_v41 }
 0x336   :  { %v1659_v25 = vpop.f32.mrf.mxu0 }
 0x337   :  { %v1660_v38 = vadd.f32 %v1659_v25, %v1658_v62 }
 0x338   :  { %v1661_v8 = vpop.f32.mrf.mxu0 }
 0x339   :  { %v1333_v31 = vadd.f32 %v1660_v38, %v1190_v1  ;;  %v1504_v38 = vshrl.u32 %v1503_v17, 7 }
 0x33a   :  { %v1662_v28 = vpop.f32.mrf.mxu0 }
 0x33b   :  { %v1663_v47 = vadd.f32 %v1662_v28, %v1661_v8 }
 0x33c   :  { %v1664_v12 = vpop.f32.mrf.mxu0 }
 0x33d   :  { %v1336_v20 = vadd.f32 %v1663_v47, %v1195_v2  ;;  %v1505_v47 = vsub.s32 0, %v1504_v38 }
 0x33e   :  { %v1665_v29 = vpop.f32.mrf.mxu0 }
 0x33f   :  { %v1666_v34 = vadd.f32 %v1665_v29, %v1664_v12  ;;  %v1464_v12 = vpop.permute.xlu1 %1463 }
 0x340   :  { %v1667_v15 = vpop.f32.mrf.mxu0 }
 0x341   :  { %v1341_v48 = vadd.f32 %v1666_v34, %v1200_v3 }
 0x342   :  { %v1668_v51 = vpop.f32.mrf.mxu0 }
 0x343   :  { %v1669_v22 = vadd.f32 %v1668_v51, %v1667_v15 }
 0x344   :  { %v1670_v55 = vpop.f32.mrf.mxu0 }
 0x345   :  { %v1344_v9 = vadd.f32 %v1669_v22, %v1205_v36 }
 0x346   :  { %v1671_v4 = vpop.f32.mrf.mxu0 }
 0x347   :  { %v1672_v59 = vadd.f32 %v1671_v4, %v1670_v55  ;;  %v1469_v55 = vpop.permute.xlu0 %1468 }
 0x348   :  { %v1673_v7 = vpop.f32.mrf.mxu0 }
 0x349   :  { %v1349_v56 = vadd.f32 %v1672_v59, %v1210_v16 }
 0x34a   :  { %v1674_v35 = vpop.f32.mrf.mxu0 }
 0x34b   :  { %v1675_v24 = vadd.f32 %v1674_v35, %v1673_v7 }
 0x34d   :  { %v1352_v52 = vadd.f32 %v1675_v24, %v1215_v37 }
 0x354   :  { %v1746_v26 = vpop.f32.mrf.mxu0 }
 0x355   :  { %v1398_v49 = vadd.f32 %v1746_v26, %v1333_v31 }
 0x356   :  { %v1389_v43 = vpop.f32.mrf.mxu0 }
 0x357   :  { %v1390_v44 = vadd.f32 %v1389_v43, %v1325_v39  ;;  %v1422_v40 = vmax.f32 %v1398_v49, 0.0 }
 0x358   :  { %v1747_v46 = vpop.f32.mrf.mxu0 }
 0x359   :  { %v1420_v30 = vmax.f32 %v1390_v44, 0.0  ;;  %v1401_v54 = vadd.f32 %v1747_v46, %v1336_v20  ;;  %v1478_v60 = vmul.f32 %v1449_v33, %v1422_v40  ;;  %v1501_v33 = vpop.permute.xlu0 %1500 }
 0x35a   :  { %v1392_v19 = vpop.f32.mrf.mxu0  ;;  %v1506_v31 = vrot.slane %v1501_v33, %v1505_v47 }
 0x35b   :  { %v1393_v21 = vadd.f32 %v1392_v19, %v1328_v53  ;;  %v1476_v57 = vmul.f32 %v1439_v6, %v1420_v30  ;;  %v1423_v13 = vmax.f32 %v1401_v54, 0.0  ;;  %v1474_v6 = vpop.permute.xlu1 %1473 }
 0x35c   :  { %v1750_v50 = vpop.f32.mrf.mxu0 }
 0x35d   :  { %v1421_v23 = vmax.f32 %v1393_v21, 0.0  ;;  %v1414_v27 = vadd.f32 %v1750_v50, %v1349_v56  ;;  %v1479_v62 = vmul.f32 %v1454_v11, %v1423_v13 }
 0x35e   :  { %v1405_v32 = vpop.f32.mrf.mxu0 }
 0x35f   :  { %v1477_v14 = vmul.f32 %v1444_v10, %v1421_v23  ;;  %v1406_v58 = vadd.f32 %v1405_v32, %v1341_v48  ;;  %v1426_v0 = vmax.f32 %v1414_v27, 0.0 }
 0x360   :  { %v1751_v63 = vpop.f32.mrf.mxu0 }
 0x361   :  { %v1484_v18 = vadd.f32 %v1477_v14, %v1476_v57  ;;  %v1424_v45 = vmax.f32 %v1406_v58, 0.0  ;;  %v1417_v8 = vadd.f32 %v1751_v63, %v1352_v52  ;;  %v1482_v3 = vmul.f32 %v1469_v55, %v1426_v0 }
 0x362   :  { %v1408_v61 = vpop.f32.mrf.mxu0 }
 0x363   :  { %v1485_v25 = vadd.f32 %v1484_v18, %v1478_v60  ;;  %v1409_v28 = vadd.f32 %v1408_v61, %v1344_v9  ;;  %v1480_v29 = vmul.f32 %v1459_v5, %v1424_v45  ;;  %v1427_v1 = vmax.f32 %v1417_v8, 0.0 }
 0x365   :  { %v1486_v41 = vadd.f32 %v1485_v25, %v1479_v62  ;;  %v1425_v15 = vmax.f32 %v1409_v28, 0.0  ;;  %v1483_v7 = vmul.f32 %v1474_v6, %v1427_v1 }
 0x367   :  { %v1487_v51 = vadd.f32 %v1486_v41, %v1480_v29  ;;  %v1481_v2 = vmul.f32 %v1464_v12, %v1425_v15 }
 0x369   :  { %v1488_v4 = vadd.f32 %v1487_v51, %v1481_v2 }
 0x36b   :  { %v1489_v10 = vadd.f32 %v1488_v4, %v1482_v3 }
 0x36d   :  { %v1490_v36 = vadd.f32 %v1489_v10, %v1483_v7 }
 0x36f   :  { %v1491_v35 = vrot.slane %v1490_v36, 4 }
 0x371   :  { %v1492_v26 = vadd.f32 %v1491_v35, %v1490_v36 }
 0x373   :  { %v1493_v42 = vrot.slane %v1492_v26, 2 }
 0x375   :  { %v1494_v39 = vadd.f32 %v1493_v42, %v1492_v26 }
 0x377   :  { %v1495_v43 = vrot.slane %v1494_v39, 1 }
 0x379   :  { %v1496_v44 = vadd.f32 %v1495_v43, %v1494_v39 }
 0x37b   :  { %v1507_v16 = vadd.f32 %v1506_v31, %v1496_v44 }
 0x37d   :  { %v1508_v46 = vsub.f32 0.0, %v1507_v16 }
 0x37f   :  { %v1509_v34 = vmul.f32 1.442695, %v1508_v46 }
 0x381   :  { %1873 = vpow2.f32 %v1509_v34 }
 0x38e   :  { %v1874_v49 = vpop.eup %1873 }
 0x38f   :  { %v1511_v20 = vadd.f32 1.0, %v1874_v49 }
 0x391   :  { %1875 = vrcp.f32 %v1511_v20 }
 0x39e   :  { %v1876_v53 = vpop.eup %1875 }
 0x39f   :  { %1514 = vst [vmem:[%s2547_s8] sm:$0x1] %v1876_v53 }

</bundles_post_ra>
